<compile_context>
chip_gen: v5e
topology: v5e:2x2
jax: 0.10.0
libtpu: 0.0.40
codegen_flags: <defaults>
</compile_context>

<pallas_src>
import jax
import jax.numpy as jnp
from jax.experimental import pallas as pl
from jax.experimental.pallas import tpu as pltpu


def _down_kernel(t_ref, w_ref, b_ref, a_ref, o_ref):
    # t_ref: (4, Cin, tm) VMEM -- the four 2x2-pool taps, spatial on lanes
    # w_ref: (Cout, Cin)  VMEM -- conv1x1 weight
    # b_ref: (Cout, 1)    VMEM -- conv bias
    # a_ref: (1,)         SMEM -- shared PReLU alpha (nn.PReLU() default)
    # o_ref: (Cout, tm)   VMEM
    # 2x2 max pool: elementwise max of the four taps (pure VPU).
    p = jnp.maximum(jnp.maximum(t_ref[0], t_ref[1]),
                    jnp.maximum(t_ref[2], t_ref[3]))            # (Cin, tm)

    cout, cin = w_ref.shape
    tm = p.shape[-1]
    # 1x1 conv as Cout*Cin broadcast FMAs on lane-dense vregs (no MXU).
    acc = jnp.zeros((cout, tm), jnp.float32)
    for ci in range(cin):                       # Cin is small & static -> unrolled
        acc = acc + w_ref[:, ci:ci + 1] * p[ci:ci + 1, :]       # (Cout,1)*(1,tm)
    y = acc + b_ref[...]                                        # bias over lanes

    alpha = a_ref[0]
    y = jnp.where(y > 0, y, alpha * y)                          # PReLU (shared alpha)
    o_ref[...] = y.astype(o_ref.dtype)


def _pick_tm(mi, tm_max=2048):
    """Largest lane-dense tile (multiple of 128) dividing mi, capped at tm_max."""
    if mi <= tm_max:
        return mi                       # full row per image (equals array dim -> legal)
    t = (tm_max // 128) * 128
    while t >= 128:
        if mi % t == 0:
            return t
        t -= 128
    return mi                           # fallback: single tile (rare odd shapes)


def down_forward(x_nchw, w_oi, bias, alpha, *, tm_max=2048):
    """Forward pass of `_down`.

    x_nchw : (N, Cin, H, W) float32
    w_oi   : (Cout, Cin)    conv1x1 weight (PyTorch (Cout, Cin, 1, 1) squeezed)
    bias   : (Cout,)
    alpha  : scalar PReLU parameter (nn.PReLU() default: one shared parameter)
    returns: (N, Cout, H//2, W//2)
    """
    N, Cin, H, W = x_nchw.shape
    Cout = w_oi.shape[0]
    Ho, Wo = H // 2, W // 2             # MaxPool2d(2) floors: drop odd row/col
    Mi = Ho * Wo

    # Gather the four pool taps into one slab (one fused XLA pass, no transposes).
    x = x_nchw[:, :, :2 * Ho, :2 * Wo].reshape(N, Cin, Ho, 2, Wo, 2)
    taps = jnp.stack(
        [x[..., 0, :, 0], x[..., 0, :, 1], x[..., 1, :, 0], x[..., 1, :, 1]],
        axis=1).reshape(N, 4, Cin, Mi)
    # TODO(synk): fold this tap gather into the kernel with strided DMAs from raw
    # HBM (memory_space=pl.ANY) to remove the one remaining wrapper pass.

    w = w_oi.astype(jnp.float32)                     # (Cout, Cin)
    b = bias.astype(jnp.float32).reshape(Cout, 1)    # (Cout, 1)
    a = jnp.asarray(alpha, jnp.float32).reshape(1)   # (1,) -> SMEM

    tm = _pick_tm(Mi, tm_max)
    grid = (N, Mi // tm)

    out = pl.pallas_call(
        _down_kernel,
        out_shape=jax.ShapeDtypeStruct((N, Cout, Mi), jnp.float32),
        grid=grid,
        in_specs=[
            pl.BlockSpec((None, 4, Cin, tm), lambda n, m: (n, 0, 0, m)),
            pl.BlockSpec((Cout, Cin), lambda n, m: (0, 0)),
            pl.BlockSpec((Cout, 1), lambda n, m: (0, 0)),
            pl.BlockSpec(memory_space=pltpu.MemorySpace.SMEM),
        ],
        out_specs=pl.BlockSpec((None, Cout, tm), lambda n, m: (n, 0, m)),
        compiler_params=pltpu.CompilerParams(
            dimension_semantics=("parallel", "parallel")),
    )(taps, w, b, a)

    # Free reshape back to NCHW (already channels-first, spatial last).
    return out.reshape(N, Cout, Ho, Wo)


def _reference(x_nchw, w_oi, bias, alpha):
    # Pure-JAX reference mirroring the PyTorch module.
    N, Cin, H, W = x_nchw.shape
    Ho, Wo = H // 2, W // 2
    x = x_nchw[:, :, :2 * Ho, :2 * Wo].reshape(N, Cin, Ho, 2, Wo, 2)
    pooled = jnp.max(x, axis=(3, 5))                              # MaxPool2d(2)
    y = jnp.einsum("nchw,oc->nohw", pooled, w_oi) + bias[None, :, None, None]
    return jnp.where(y > 0, y, alpha * y)                         # PReLU (shared)


if __name__ == "__main__":
    key = jax.random.PRNGKey(0)
    k1, k2, k3 = jax.random.split(key, 3)

    # Small shapes consistent with the module: batch=2, channel_in=4, 16x16.
    N, Cin, H, W = 2, 4, 16, 16
    Cout = 2 * Cin

    x = jax.random.normal(k1, (N, Cin, H, W), jnp.float32)
    w_oi = 0.1 * jax.random.normal(k2, (Cout, Cin), jnp.float32)  # Conv2d weight squeezed
    bias = 0.05 * jax.random.normal(k3, (Cout,), jnp.float32)
    alpha = jnp.float32(0.25)                                     # nn.PReLU() default init

    fwd = jax.jit(down_forward)
    out = jax.block_until_ready(fwd(x, w_oi, bias, alpha))

    ref = _reference(x, w_oi, bias, alpha)
    assert out.shape == (N, Cout, H // 2, W // 2), out.shape
    assert jnp.allclose(out, ref, atol=1e-5, rtol=1e-5), "mismatch vs reference"

    print("KERNEL_OK")
</pallas_src>

<mosaic_0001>
module attributes {stable_mosaic.version = 11 : i64} {
  func.func @_down_kernel(%arg0: i32, %arg1: i32, %arg2: memref<1x4x4x64xf32, #tpu.memory_space<vmem>>, %arg3: memref<8x4xf32, #tpu.memory_space<vmem>>, %arg4: memref<8x1xf32, #tpu.memory_space<vmem>>, %arg5: memref<1xf32, #tpu.memory_space<smem>>, %arg6: memref<1x8x64xf32, #tpu.memory_space<vmem>>) attributes {dimension_semantics = [#tpu.dimension_semantics<parallel>, #tpu.dimension_semantics<parallel>], iteration_bounds = array<i64: 2, 1>, scalar_prefetch = 0 : i64, scratch_operands = 0 : i64, tpu.core_type = #tpu.core_type<tc>, window_params = [{transform_indices = @transform_0, window_bounds = array<i64: 1, 4, 4, 64>}, {pipeline_mode = #tpu.pipeline_mode<synchronous>, transform_indices = @transform_1, window_bounds = array<i64: 8, 4>}, {pipeline_mode = #tpu.pipeline_mode<synchronous>, transform_indices = @transform_2, window_bounds = array<i64: 8, 1>}, {transform_indices = @transform_3, window_bounds = array<i64: 1>}, {transform_indices = @transform_4, window_bounds = array<i64: 1, 8, 64>}]} {
    %c0 = arith.constant 0 : index
    %c0_0 = arith.constant 0 : index
    %c0_1 = arith.constant 0 : index
    %c0_2 = arith.constant 0 : index
    %0 = vector.load %arg2[%c0, %c0_0, %c0_1, %c0_2] : memref<1x4x4x64xf32, #tpu.memory_space<vmem>>, vector<1x1x4x64xf32>
    %1 = vector.shape_cast %0 : vector<1x1x4x64xf32> to vector<4x64xf32>
    %c0_3 = arith.constant 0 : index
    %c1 = arith.constant 1 : index
    %c0_4 = arith.constant 0 : index
    %c0_5 = arith.constant 0 : index
    %2 = vector.load %arg2[%c0_3, %c1, %c0_4, %c0_5] : memref<1x4x4x64xf32, #tpu.memory_space<vmem>>, vector<1x1x4x64xf32>
    %3 = vector.shape_cast %2 : vector<1x1x4x64xf32> to vector<4x64xf32>
    %4 = arith.maximumf %1, %3 : vector<4x64xf32>
    %c0_6 = arith.constant 0 : index
    %c2 = arith.constant 2 : index
    %c0_7 = arith.constant 0 : index
    %c0_8 = arith.constant 0 : index
    %5 = vector.load %arg2[%c0_6, %c2, %c0_7, %c0_8] : memref<1x4x4x64xf32, #tpu.memory_space<vmem>>, vector<1x1x4x64xf32>
    %6 = vector.shape_cast %5 : vector<1x1x4x64xf32> to vector<4x64xf32>
    %c0_9 = arith.constant 0 : index
    %c3 = arith.constant 3 : index
    %c0_10 = arith.constant 0 : index
    %c0_11 = arith.constant 0 : index
    %7 = vector.load %arg2[%c0_9, %c3, %c0_10, %c0_11] : memref<1x4x4x64xf32, #tpu.memory_space<vmem>>, vector<1x1x4x64xf32>
    %8 = vector.shape_cast %7 : vector<1x1x4x64xf32> to vector<4x64xf32>
    %9 = arith.maximumf %6, %8 : vector<4x64xf32>
    %10 = arith.maximumf %4, %9 : vector<4x64xf32>
    %cst = arith.constant 0.000000e+00 : f32
    %11 = vector.broadcast %cst : f32 to vector<8x64xf32>
    %c0_12 = arith.constant 0 : index
    %c0_13 = arith.constant 0 : index
    %12 = vector.load %arg3[%c0_12, %c0_13] : memref<8x4xf32, #tpu.memory_space<vmem>>, vector<8x1xf32>
    %13 = vector.extract_strided_slice %10 {offsets = [0, 0], sizes = [1, 64], strides = [1, 1]} : vector<4x64xf32> to vector<1x64xf32>
    %14 = vector.broadcast %12 : vector<8x1xf32> to vector<8x64xf32>
    %15 = vector.broadcast %13 : vector<1x64xf32> to vector<8x64xf32>
    %16 = arith.mulf %14, %15 : vector<8x64xf32>
    %17 = arith.addf %11, %16 : vector<8x64xf32>
    %c0_14 = arith.constant 0 : index
    %c1_15 = arith.constant 1 : index
    %18 = vector.load %arg3[%c0_14, %c1_15] : memref<8x4xf32, #tpu.memory_space<vmem>>, vector<8x1xf32>
    %19 = vector.extract_strided_slice %10 {offsets = [1, 0], sizes = [1, 64], strides = [1, 1]} : vector<4x64xf32> to vector<1x64xf32>
    %20 = vector.broadcast %18 : vector<8x1xf32> to vector<8x64xf32>
    %21 = vector.broadcast %19 : vector<1x64xf32> to vector<8x64xf32>
    %22 = arith.mulf %20, %21 : vector<8x64xf32>
    %23 = arith.addf %17, %22 : vector<8x64xf32>
    %c0_16 = arith.constant 0 : index
    %c2_17 = arith.constant 2 : index
    %24 = vector.load %arg3[%c0_16, %c2_17] : memref<8x4xf32, #tpu.memory_space<vmem>>, vector<8x1xf32>
    %25 = vector.extract_strided_slice %10 {offsets = [2, 0], sizes = [1, 64], strides = [1, 1]} : vector<4x64xf32> to vector<1x64xf32>
    %26 = vector.broadcast %24 : vector<8x1xf32> to vector<8x64xf32>
    %27 = vector.broadcast %25 : vector<1x64xf32> to vector<8x64xf32>
    %28 = arith.mulf %26, %27 : vector<8x64xf32>
    %29 = arith.addf %23, %28 : vector<8x64xf32>
    %c0_18 = arith.constant 0 : index
    %c3_19 = arith.constant 3 : index
    %30 = vector.load %arg3[%c0_18, %c3_19] : memref<8x4xf32, #tpu.memory_space<vmem>>, vector<8x1xf32>
    %31 = vector.extract_strided_slice %10 {offsets = [3, 0], sizes = [1, 64], strides = [1, 1]} : vector<4x64xf32> to vector<1x64xf32>
    %32 = vector.broadcast %30 : vector<8x1xf32> to vector<8x64xf32>
    %33 = vector.broadcast %31 : vector<1x64xf32> to vector<8x64xf32>
    %34 = arith.mulf %32, %33 : vector<8x64xf32>
    %35 = arith.addf %29, %34 : vector<8x64xf32>
    %c0_20 = arith.constant 0 : index
    %c0_21 = arith.constant 0 : index
    %36 = vector.load %arg4[%c0_20, %c0_21] : memref<8x1xf32, #tpu.memory_space<vmem>>, vector<8x1xf32>
    %37 = vector.broadcast %36 : vector<8x1xf32> to vector<8x64xf32>
    %38 = arith.addf %35, %37 : vector<8x64xf32>
    %c0_22 = arith.constant 0 : index
    %39 = memref.load %arg5[%c0_22] : memref<1xf32, #tpu.memory_space<smem>>
    %cst_23 = arith.constant 0.000000e+00 : f32
    %40 = vector.broadcast %cst_23 : f32 to vector<8x64xf32>
    %41 = arith.cmpf ogt, %38, %40 : vector<8x64xf32>
    %42 = vector.broadcast %39 : f32 to vector<8x64xf32>
    %43 = arith.mulf %42, %38 : vector<8x64xf32>
    %44 = arith.select %41, %38, %43 : vector<8x64xi1>, vector<8x64xf32>
    %c0_24 = arith.constant 0 : index
    %c0_25 = arith.constant 0 : index
    %c0_26 = arith.constant 0 : index
    %45 = vector.load %arg6[%c0_24, %c0_25, %c0_26] : memref<1x8x64xf32, #tpu.memory_space<vmem>>, vector<1x8x64xf32>
    %46 = vector.shape_cast %45 : vector<1x8x64xf32> to vector<8x64xf32>
    %47 = vector.shape_cast %44 : vector<8x64xf32> to vector<1x8x64xf32>
    tpu.vector_store %arg6[%c0_24, %c0_25, %c0_26], %47 {strides = array<i32>} : memref<1x8x64xf32, #tpu.memory_space<vmem>>, vector<1x8x64xf32>,
    return
  }
  func.func @transform_0(%arg0: i32, %arg1: i32) -> (i32, i32, i32, i32) {
    %c0_i32 = arith.constant 0 : i32
    %c0_i32_0 = arith.constant 0 : i32
    %c0_i32_1 = arith.constant 0 : i32
    return %arg0, %c0_i32, %c0_i32_0, %arg1 : i32, i32, i32, i32
  }
  func.func @transform_1(%arg0: i32, %arg1: i32) -> (i32, i32) {
    %c0_i32 = arith.constant 0 : i32
    %c0_i32_0 = arith.constant 0 : i32
    %c0_i32_1 = arith.constant 0 : i32
    return %c0_i32, %c0_i32_0 : i32, i32
  }
  func.func @transform_2(%arg0: i32, %arg1: i32) -> (i32, i32) {
    %c0_i32 = arith.constant 0 : i32
    %c0_i32_0 = arith.constant 0 : i32
    %c0_i32_1 = arith.constant 0 : i32
    return %c0_i32, %c0_i32_0 : i32, i32
  }
  func.func @transform_3(%arg0: i32, %arg1: i32) -> i32 {
    %c0_i32 = arith.constant 0 : i32
    %c0_i32_0 = arith.constant 0 : i32
    return %c0_i32 : i32
  }
  func.func @transform_4(%arg0: i32, %arg1: i32) -> (i32, i32, i32) {
    %c0_i32 = arith.constant 0 : i32
    %c0_i32_0 = arith.constant 0 : i32
    return %arg0, %c0_i32, %arg1 : i32, i32, i32
  }
}

</mosaic_0001>

<bundles_post_ra>
// kernel: down_forward.1
= control target key start
LH: loop header
LB: loop body
LE: loop exit
PB: predicated region body
PF: predicated region fallthrough
CT: control target
= control target key end

     0   :  { %s463_s17 = smov 0   ;;  %s465_s18 = smov 0   ;;  %s506_s0 = inlined_call_operand.vmem [shape: f32[2,4,4,64], index: 0, kind: input, shape index: {}]   ;;  %s507_s1 = inlined_call_operand.vmem [shape: f32[8,4], index: 1, kind: input, shape index: {}]   ;;  %s508_s2 = inlined_call_operand.vmem [shape: f32[8,1], index: 2, kind: input, shape index: {}]   ;;  %s509_s3 = inlined_call_operand.<no memory space> [shape: f32[1], index: 3, kind: input, shape index: {}]   ;;  %s510_s4 = inlined_call_operand.vmem [shape: f32[2,8,64], index: 4, kind: output, shape index: {}]  }
   0x1   :  { %9 = sst [smem:[#allocation2]] %s509_s3  ;;  %s467_s19 = smov 0  }
   0x2 LB: > { %s27_s3 = sadd.s32 1, %s425_s18  ;;  %p363_p0 = scmp.ge.s32.totalorder %s429_s19, 1  ;;  %s429_s19 = sphi %s467_s19, %s15_s19   ;;  %s425_s18 = sphi %s465_s18, %s512_s18   ;;  %s421_s17 = sphi %s463_s17, %s511_s17  }
   0x3   : > { %p29_p1 = scmp.ge.s32.totalorder %s27_s3, 2  ;;  %p182_p2 = scmp.lt.s32.totalorder %s429_s19, 3 }
   0x5   : > { %s514_s3 = smov (%p29_p1, %s27_s3), 0  ;;  %p183_p3 = pnand %p363_p0, %p182_p2 }
   0x6   : > { %p213_p4 = scmp.lt.s32.totalorder (!%p183_p3), %s421_s17, 1  ;;  %s275_s28 = sld [smem:[#allocation2]] (!%p183_p3) }
   0x7   : > { %186 = sbr.rel (%p183_p3) target bundleno = 152 (0x98), region = 36 }
   0xc   : > { %v238_v0 = vld [vmem:[%s507_s1] sm:$0xff]  ;;  %v431_v1 = vmov 0   ;;  %v432_v2 = vmov 2   ;;  %v433_v4 = vmov 1   ;;  %v434_v5 = vmov 3   ;;  %s516_s17 = smov (!%p213_p4, %s421_s17), 1 }
   0xd   : > { %401 = vset.pattern.permute.xlu0 %v431_v1  ;;  %403 = vset.pattern.permute.xlu1 %v432_v2  ;;  %v268_v3 = vld [vmem:[%s508_s2] sm:$0xff]  ;;  %s372_s24 = sshll.u32 %s516_s17, 4  ;;  %v277_v29 = vstv %s275_s28  ;;  %s366_s29 = sshll.u32 %s516_s17, 3  ;;  %vm280_vm0 = vcmask 523264  }
   0xe   : > { %241 = vperm.xlu0 %401, %v238_v0   ;;  %255 = vperm.xlu1 %403, %v238_v0   ;;  %s220_s27 = scalar_lea.vmem %s506_s0, %s372_s24  ;;  %s227_s6 = scalar_lea.vmem %s510_s4, %s366_s29 }
   0xf   : > { %405 = vset.pattern.permute.xlu2 %v431_v1  ;;  %v228_v6 = vld [vmem:[%s220_s27] sm:$0xf]  ;;  %v367_v7 = vld [vmem:[%s220_s27 + $0x4] sm:$0xf]  ;;  %v368_v8 = vld [vmem:[%s220_s27 + $0x8] sm:$0xf] }
  0x10   : > { %271 = vperm.xlu2 %405, %v268_v3   ;;  %v369_v9 = vld [vmem:[%s220_s27 + $0xc] sm:$0xf]  ;;  %v231_v10 = vmax.f32 %v228_v6, %v367_v7 }
  0x11   : > { %v236_v11 = vmax.f32 %v368_v8, %v369_v9 }
  0x13   : > { %v237_v14 = vmax.f32 %v231_v10, %v236_v11 }
  0x15   : > { %v244_v15 = vperm.slane %v237_v14, 0  ;;  %v251_v16 = vperm.slane %v237_v14, 1  ;;  %v258_v17 = vperm.slane %v237_v14, 2  ;;  %v265_v18 = vperm.slane %v237_v14, 3 }
  0x16   : > { %402 = vset.pattern.permute.xlu0 %v433_v4  ;;  %404 = vset.pattern.permute.xlu1 %v434_v5 }
  0x17   : > { %248 = vperm.xlu0 %402, %v238_v0   ;;  %262 = vperm.xlu1 %404, %v238_v0  }
  0x1f   : > { %406 = vset.pattern.permute.xlu0 %v431_v1 }
  0x6a   : > { %v272_v27 = vpop.permute.xlu2 %271 }
  0x80   : > { %v242_v12 = vpop.permute.xlu0 %241  ;;  %v256_v13 = vpop.permute.xlu1 %255 }
  0x81   : > { %v245_v21 = vmul.f32 %v244_v15, %v242_v12  ;;  %v259_v23 = vmul.f32 %v258_v17, %v256_v13 }
  0x89   : > { %v249_v19 = vpop.permute.xlu0 %248  ;;  %v263_v20 = vpop.permute.xlu1 %262 }
  0x8a   : > { %v252_v22 = vmul.f32 %v251_v16, %v249_v19  ;;  %v266_v25 = vmul.f32 %v265_v18, %v263_v20 }
  0x8c   : > { %v253_v24 = vadd.f32 %v252_v22, %v245_v21 }
  0x8e   : > { %v260_v26 = vadd.f32 %v259_v23, %v253_v24 }
  0x90   : > { %v267_v28 = vadd.f32 %v266_v25, %v260_v26 }
  0x92   : > { %v274_v30 = vadd.f32 %v272_v27, %v267_v28 }
  0x94   : > { %vm276_vm1 = vcmp.gt.f32.partialorder %v274_v30, 0.0  ;;  %v278_v31 = vmul.f32 %v277_v29, %v274_v30 }
  0x96   : > { %v279_v32 = vsel %vm276_vm1, %v274_v30, %v278_v31 }
  0x97   : > { %281 = vst.msk [vmem:[%s227_s6] sm:$0xff] %vm280_vm0, %v279_v32 }
  0x98 PF: > { %s15_s19 = sadd.s32 1, %s429_s19   ;;  %s511_s17 = smov %s425_s18 }
  0x99   : > { %p12_p5 = scmp.ge.s32.totalorder %s15_s19, 4   ;;  %s512_s18 = smov %s514_s3 }
  0x9b   :  { %14 = sbr.rel (!%p12_p5) target bundleno = 2 (0x2), region = 69 }

</bundles_post_ra>
